<compile_context>
chip_gen: v6e
topology: v6e:2x2x1
jax: 0.10.0
libtpu: 0.0.40
codegen_flags: <defaults>
</compile_context>

<pallas_src>
import functools

import jax
import jax.numpy as jnp
from jax.experimental import pallas as pl
from jax.experimental.pallas import tpu as pltpu


def _make_reduce_kernel(C, rb, n_rows, ragged):
    """Build the per-tile reduction kernel.

    Block shapes: t_ref / l_ref are (1, C, rb, 128); the three outputs are
    (1, C, 1, 128) and stay resident (accumulate) across the last grid axis.
    """

    def kernel(t_ref, l_ref, tsum_ref, tl_ref, lsum_ref):
        j = pl.program_id(1)

        @pl.when(j == 0)
        def _init():
            tsum_ref[...] = jnp.zeros_like(tsum_ref)
            tl_ref[...] = jnp.zeros_like(tl_ref)
            lsum_ref[...] = jnp.zeros_like(lsum_ref)

        t = t_ref[0].astype(jnp.float32)   # (C, rb, 128)
        l = l_ref[0].astype(jnp.float32)

        if ragged:
            # Last tile along the row axis overhangs the array: mask rows that
            # fall outside the valid range (overhang reads are unspecified).
            rows_valid = n_rows - j * rb
            row_ids = jax.lax.broadcasted_iota(jnp.int32, (C, rb, 128), 1)
            keep = row_ids < rows_valid
            t = jnp.where(keep, t, 0.0)
            l = jnp.where(keep, l, 0.0)

        # Reduce only over the sublane (row) axis per tile; keep the 128 lanes
        # as a dense partial accumulator.  The single cross-lane reduce happens
        # once in the wrapper, not per tile.  sum(t + l) is never materialized:
        # union is reconstructed from sum(t) + sum(l) outside the kernel.
        tsum_ref[...] += jnp.sum(t, axis=1)[None, :, None, :]
        tl_ref[...] += jnp.sum(t * l, axis=1)[None, :, None, :]
        lsum_ref[...] += jnp.sum(l, axis=1)[None, :, None, :]

    return kernel


def _channel_reductions(targets4, logits4, *, tile_rows):
    """Per-channel partial sums of t, t*l, l.

    targets4 / logits4: (N, C, R, 128).  Returns three (N, C, 1, 128) arrays
    of lane partials (caller reduces over axes (0, 2, 3)).
    """
    N, C, R, L = targets4.shape
    assert L == 128
    assert tile_rows % 8 == 0

    # rb is either the full row extent (small inputs) or a multiple of 8.
    rb = R if R <= tile_rows else tile_rows
    num_tiles = -(-R // rb)
    ragged = (R % rb) != 0

    in_spec = pl.BlockSpec((1, C, rb, 128), lambda n, j: (n, 0, j, 0))
    out_spec = pl.BlockSpec((1, C, 1, 128), lambda n, j: (n, 0, 0, 0))
    out_shape = tuple(
        jax.ShapeDtypeStruct((N, C, 1, 128), jnp.float32) for _ in range(3))

    return pl.pallas_call(
        _make_reduce_kernel(C, rb, R, ragged),
        out_shape=out_shape,
        grid_spec=pltpu.PrefetchScalarGridSpec(
            num_scalar_prefetch=0,
            grid=(N, num_tiles),                 # reduction axis last
            in_specs=[in_spec, in_spec],
            out_specs=[out_spec, out_spec, out_spec],
        ),
        compiler_params=pltpu.CompilerParams(
            # Batch axis may be split across TensorCores (v7x megacore); the
            # spatial axis carries the resident accumulators -> "arbitrary".
            dimension_semantics=("parallel", "arbitrary"),
        ),
    )(targets4, logits4)


@functools.partial(jax.jit, static_argnames=("tile_rows",))
def weight_dice_loss(logits, targets, *, tile_rows=1024):
    """Pallas implementation of WeightDiceLoss.forward.

    logits, targets: (N, C, D, H, W) float arrays (the PyTorch module
    hard-codes a 3-element weight vector, i.e. C == 3).  Returns a scalar
    float32 loss.

    tile_rows: sublane rows per grid step.  Each input tile is
    C * tile_rows * 128 * 4 B (1.5 MiB at the default 1024 with C=3), so the
    double-buffered working set (~6 MiB) fits the default scoped-VMEM limit
    on v5e / v6e / v7x.
    """
    N, C, D, H, W = logits.shape
    S = D * H * W

    # Free reshapes only -- no NCDHW transpose, no extra HBM pass (unless the
    # spatial extent needs lane padding, which only touches the tail).
    logits_f = logits.reshape(N, C, S)
    targets_f = targets.reshape(N, C, S)
    pad = (-S) % 128
    if pad:
        # Zero padding is exactly neutral for sum(t), sum(t*l), sum(l).
        logits_f = jnp.pad(logits_f, ((0, 0), (0, 0), (0, pad)))
        targets_f = jnp.pad(targets_f, ((0, 0), (0, 0), (0, pad)))
    R = (S + pad) // 128
    logits4 = logits_f.reshape(N, C, R, 128)
    targets4 = targets_f.reshape(N, C, R, 128)

    tsum_p, tl_p, lsum_p = _channel_reductions(
        targets4, logits4, tile_rows=tile_rows)

    num_sum = jnp.sum(tsum_p, axis=(0, 2, 3))               # (C,)  sum(t)
    inter_ch = jnp.sum(tl_p, axis=(0, 2, 3))                # (C,)  sum(t*l)
    union_ch = num_sum + jnp.sum(lsum_p, axis=(0, 2, 3))    # sum(t) + sum(l)

    # Weight computation: tiny scalar glue, plain JAX.
    # PyTorch's num_sum[i-1] / num_sum[i-2] use negative-index wraparound,
    # which is exactly jnp.roll.
    total = jnp.sum(num_sum)
    w_raw = (0.1 * num_sum + jnp.roll(num_sum, 1) + jnp.roll(num_sum, 2)
             + 1.0) / (total + 1.0)
    w = jnp.where(num_sum < 1.0, 0.0, w_raw)
    # TODO(synk): the PyTorch forward also print()s w; host-print side-effect
    # inside the jitted forward is intentionally omitted.

    inter = jnp.sum(w * inter_ch)
    union = jnp.sum(w * union_ch)
    return 1.0 - 2.0 * inter / union


def _reference(logits, targets):
    """Pure-JAX reference mirroring the PyTorch forward."""
    num_sum = jnp.sum(targets, axis=(0, 2, 3, 4))
    total = jnp.sum(num_sum)
    w_raw = (0.1 * num_sum + jnp.roll(num_sum, 1) + jnp.roll(num_sum, 2)
             + 1.0) / (total + 1.0)
    w = jnp.where(num_sum < 1.0, 0.0, w_raw)
    inter = jnp.sum(w * jnp.sum(targets * logits, axis=(0, 2, 3, 4)))
    union = jnp.sum(w * jnp.sum(targets + logits, axis=(0, 2, 3, 4)))
    return 1.0 - 2.0 * inter / union


if __name__ == "__main__":
    key = jax.random.PRNGKey(0)

    def make_inputs(k, shape):
        N, C, D, H, W = shape
        k1, k2 = jax.random.split(k)
        logits = jax.nn.sigmoid(
            jax.random.normal(k1, shape, dtype=jnp.float32))
        labels = jax.random.randint(k2, (N, D, H, W), 0, C)
        targets = jnp.transpose(
            jax.nn.one_hot(labels, C, dtype=jnp.float32), (0, 4, 1, 2, 3))
        return logits, targets

    # (shape, tile_rows): cover the dense single-tile path, the multi-tile
    # ragged-mask path, and the lane-padding (S % 128 != 0) path.
    configs = [
        ((2, 3, 8, 16, 16), 1024),   # S=2048, R=16: one dense tile
        ((2, 3, 4, 8, 80), 8),       # S=2560, R=20: 3 tiles, ragged last tile
        ((1, 3, 3, 7, 11), 1024),    # S=231: padded to 256, R=2
    ]
    for cfg_key, (shape, tr) in zip(jax.random.split(key, len(configs)),
                                    configs):
        logits, targets = make_inputs(cfg_key, shape)
        out = jax.block_until_ready(
            weight_dice_loss(logits, targets, tile_rows=tr))
        ref = _reference(logits, targets)
        assert jnp.allclose(out, ref, rtol=1e-4, atol=1e-5), (shape, out, ref)

    print("KERNEL_OK")
</pallas_src>

<mosaic_0001>
module attributes {stable_mosaic.version = 11 : i64} {
  func.func @kernel(%arg0: i32, %arg1: i32, %arg2: memref<1x3x16x128xf32, #tpu.memory_space<vmem>>, %arg3: memref<1x3x16x128xf32, #tpu.memory_space<vmem>>, %arg4: memref<1x3x1x128xf32, #tpu.memory_space<vmem>>, %arg5: memref<1x3x1x128xf32, #tpu.memory_space<vmem>>, %arg6: memref<1x3x1x128xf32, #tpu.memory_space<vmem>>) attributes {dimension_semantics = [#tpu.dimension_semantics<parallel>, #tpu.dimension_semantics<arbitrary>], iteration_bounds = array<i64: 2, 1>, scalar_prefetch = 0 : i64, scratch_operands = 0 : i64, tpu.core_type = #tpu.core_type<tc>, window_params = [{transform_indices = @transform_0, window_bounds = array<i64: 1, 3, 16, 128>}, {transform_indices = @transform_1, window_bounds = array<i64: 1, 3, 16, 128>}, {transform_indices = @transform_2, window_bounds = array<i64: 1, 3, 1, 128>}, {transform_indices = @transform_3, window_bounds = array<i64: 1, 3, 1, 128>}, {transform_indices = @transform_4, window_bounds = array<i64: 1, 3, 1, 128>}]} {
    %c0_i32 = arith.constant 0 : i32
    %0 = arith.cmpi eq, %arg1, %c0_i32 : i32
    %1 = arith.extui %0 : i1 to i32
    %c0_i32_0 = arith.constant 0 : i32
    %2 = arith.cmpi ne, %1, %c0_i32_0 : i32
    scf.if %2 {
      %cst_34 = arith.constant 0.000000e+00 : f32
      %23 = vector.broadcast %cst_34 : f32 to vector<1x3x1x128xf32>
      %c0_35 = arith.constant 0 : index
      %c0_36 = arith.constant 0 : index
      %c0_37 = arith.constant 0 : index
      %c0_38 = arith.constant 0 : index
      %24 = vector.load %arg4[%c0_35, %c0_36, %c0_37, %c0_38] : memref<1x3x1x128xf32, #tpu.memory_space<vmem>>, vector<1x3x1x128xf32>
      tpu.vector_store %arg4[%c0_35, %c0_36, %c0_37, %c0_38], %23 {strides = array<i32>} : memref<1x3x1x128xf32, #tpu.memory_space<vmem>>, vector<1x3x1x128xf32>,
      %cst_39 = arith.constant 0.000000e+00 : f32
      %25 = vector.broadcast %cst_39 : f32 to vector<1x3x1x128xf32>
      %c0_40 = arith.constant 0 : index
      %c0_41 = arith.constant 0 : index
      %c0_42 = arith.constant 0 : index
      %c0_43 = arith.constant 0 : index
      %26 = vector.load %arg5[%c0_40, %c0_41, %c0_42, %c0_43] : memref<1x3x1x128xf32, #tpu.memory_space<vmem>>, vector<1x3x1x128xf32>
      tpu.vector_store %arg5[%c0_40, %c0_41, %c0_42, %c0_43], %25 {strides = array<i32>} : memref<1x3x1x128xf32, #tpu.memory_space<vmem>>, vector<1x3x1x128xf32>,
      %cst_44 = arith.constant 0.000000e+00 : f32
      %27 = vector.broadcast %cst_44 : f32 to vector<1x3x1x128xf32>
      %c0_45 = arith.constant 0 : index
      %c0_46 = arith.constant 0 : index
      %c0_47 = arith.constant 0 : index
      %c0_48 = arith.constant 0 : index
      %28 = vector.load %arg6[%c0_45, %c0_46, %c0_47, %c0_48] : memref<1x3x1x128xf32, #tpu.memory_space<vmem>>, vector<1x3x1x128xf32>
      tpu.vector_store %arg6[%c0_45, %c0_46, %c0_47, %c0_48], %27 {strides = array<i32>} : memref<1x3x1x128xf32, #tpu.memory_space<vmem>>, vector<1x3x1x128xf32>,
    } else {
    }
    %c0 = arith.constant 0 : index
    %c0_1 = arith.constant 0 : index
    %c0_2 = arith.constant 0 : index
    %c0_3 = arith.constant 0 : index
    %3 = vector.load %arg2[%c0, %c0_1, %c0_2, %c0_3] : memref<1x3x16x128xf32, #tpu.memory_space<vmem>>, vector<1x3x16x128xf32>
    %4 = vector.shape_cast %3 : vector<1x3x16x128xf32> to vector<3x16x128xf32>
    %c0_4 = arith.constant 0 : index
    %c0_5 = arith.constant 0 : index
    %c0_6 = arith.constant 0 : index
    %c0_7 = arith.constant 0 : index
    %5 = vector.load %arg3[%c0_4, %c0_5, %c0_6, %c0_7] : memref<1x3x16x128xf32, #tpu.memory_space<vmem>>, vector<1x3x16x128xf32>
    %6 = vector.shape_cast %5 : vector<1x3x16x128xf32> to vector<3x16x128xf32>
    %c0_8 = arith.constant 0 : index
    %c0_9 = arith.constant 0 : index
    %c0_10 = arith.constant 0 : index
    %c0_11 = arith.constant 0 : index
    %7 = vector.load %arg4[%c0_8, %c0_9, %c0_10, %c0_11] : memref<1x3x1x128xf32, #tpu.memory_space<vmem>>, vector<1x3x1x128xf32>
    %cst = arith.constant dense<0.000000e+00> : vector<3x128xf32>
    %8 = vector.multi_reduction <add>, %4, %cst [1] : vector<3x16x128xf32> to vector<3x128xf32>
    %9 = vector.shape_cast %8 : vector<3x128xf32> to vector<1x3x1x128xf32>
    %10 = arith.addf %7, %9 : vector<1x3x1x128xf32>
    %c0_12 = arith.constant 0 : index
    %c0_13 = arith.constant 0 : index
    %c0_14 = arith.constant 0 : index
    %c0_15 = arith.constant 0 : index
    %11 = vector.load %arg4[%c0_12, %c0_13, %c0_14, %c0_15] : memref<1x3x1x128xf32, #tpu.memory_space<vmem>>, vector<1x3x1x128xf32>
    tpu.vector_store %arg4[%c0_12, %c0_13, %c0_14, %c0_15], %10 {strides = array<i32>} : memref<1x3x1x128xf32, #tpu.memory_space<vmem>>, vector<1x3x1x128xf32>,
    %c0_16 = arith.constant 0 : index
    %c0_17 = arith.constant 0 : index
    %c0_18 = arith.constant 0 : index
    %c0_19 = arith.constant 0 : index
    %12 = vector.load %arg5[%c0_16, %c0_17, %c0_18, %c0_19] : memref<1x3x1x128xf32, #tpu.memory_space<vmem>>, vector<1x3x1x128xf32>
    %13 = arith.mulf %4, %6 : vector<3x16x128xf32>
    %cst_20 = arith.constant dense<0.000000e+00> : vector<3x128xf32>
    %14 = vector.multi_reduction <add>, %13, %cst_20 [1] : vector<3x16x128xf32> to vector<3x128xf32>
    %15 = vector.shape_cast %14 : vector<3x128xf32> to vector<1x3x1x128xf32>
    %16 = arith.addf %12, %15 : vector<1x3x1x128xf32>
    %c0_21 = arith.constant 0 : index
    %c0_22 = arith.constant 0 : index
    %c0_23 = arith.constant 0 : index
    %c0_24 = arith.constant 0 : index
    %17 = vector.load %arg5[%c0_21, %c0_22, %c0_23, %c0_24] : memref<1x3x1x128xf32, #tpu.memory_space<vmem>>, vector<1x3x1x128xf32>
    tpu.vector_store %arg5[%c0_21, %c0_22, %c0_23, %c0_24], %16 {strides = array<i32>} : memref<1x3x1x128xf32, #tpu.memory_space<vmem>>, vector<1x3x1x128xf32>,
    %c0_25 = arith.constant 0 : index
    %c0_26 = arith.constant 0 : index
    %c0_27 = arith.constant 0 : index
    %c0_28 = arith.constant 0 : index
    %18 = vector.load %arg6[%c0_25, %c0_26, %c0_27, %c0_28] : memref<1x3x1x128xf32, #tpu.memory_space<vmem>>, vector<1x3x1x128xf32>
    %cst_29 = arith.constant dense<0.000000e+00> : vector<3x128xf32>
    %19 = vector.multi_reduction <add>, %6, %cst_29 [1] : vector<3x16x128xf32> to vector<3x128xf32>
    %20 = vector.shape_cast %19 : vector<3x128xf32> to vector<1x3x1x128xf32>
    %21 = arith.addf %18, %20 : vector<1x3x1x128xf32>
    %c0_30 = arith.constant 0 : index
    %c0_31 = arith.constant 0 : index
    %c0_32 = arith.constant 0 : index
    %c0_33 = arith.constant 0 : index
    %22 = vector.load %arg6[%c0_30, %c0_31, %c0_32, %c0_33] : memref<1x3x1x128xf32, #tpu.memory_space<vmem>>, vector<1x3x1x128xf32>
    tpu.vector_store %arg6[%c0_30, %c0_31, %c0_32, %c0_33], %21 {strides = array<i32>} : memref<1x3x1x128xf32, #tpu.memory_space<vmem>>, vector<1x3x1x128xf32>,
    return
  }
  func.func @transform_0(%arg0: i32, %arg1: i32) -> (i32, i32, i32, i32) {
    %c0_i32 = arith.constant 0 : i32
    %c0_i32_0 = arith.constant 0 : i32
    %c0_i32_1 = arith.constant 0 : i32
    return %arg0, %c0_i32, %arg1, %c0_i32_0 : i32, i32, i32, i32
  }
  func.func @transform_1(%arg0: i32, %arg1: i32) -> (i32, i32, i32, i32) {
    %c0_i32 = arith.constant 0 : i32
    %c0_i32_0 = arith.constant 0 : i32
    %c0_i32_1 = arith.constant 0 : i32
    return %arg0, %c0_i32, %arg1, %c0_i32_0 : i32, i32, i32, i32
  }
  func.func @transform_2(%arg0: i32, %arg1: i32) -> (i32, i32, i32, i32) {
    %c0_i32 = arith.constant 0 : i32
    %c0_i32_0 = arith.constant 0 : i32
    %c0_i32_1 = arith.constant 0 : i32
    %c0_i32_2 = arith.constant 0 : i32
    return %arg0, %c0_i32, %c0_i32_0, %c0_i32_1 : i32, i32, i32, i32
  }
  func.func @transform_3(%arg0: i32, %arg1: i32) -> (i32, i32, i32, i32) {
    %c0_i32 = arith.constant 0 : i32
    %c0_i32_0 = arith.constant 0 : i32
    %c0_i32_1 = arith.constant 0 : i32
    %c0_i32_2 = arith.constant 0 : i32
    return %arg0, %c0_i32, %c0_i32_0, %c0_i32_1 : i32, i32, i32, i32
  }
  func.func @transform_4(%arg0: i32, %arg1: i32) -> (i32, i32, i32, i32) {
    %c0_i32 = arith.constant 0 : i32
    %c0_i32_0 = arith.constant 0 : i32
    %c0_i32_1 = arith.constant 0 : i32
    %c0_i32_2 = arith.constant 0 : i32
    return %arg0, %c0_i32, %c0_i32_0, %c0_i32_1 : i32, i32, i32, i32
  }
}

</mosaic_0001>

<bundles_post_ra>
// kernel: weight_dice_loss.1
= control target key start
LH: loop header
LB: loop body
LE: loop exit
PB: predicated region body
PF: predicated region fallthrough
CT: control target
= control target key end

     0   :  { %s635_s15 = smov 0   ;;  %s637_s16 = smov 0   ;;  %s710_s0 = inlined_call_operand.vmem [shape: f32[2,3,16,128], index: 0, kind: input, shape index: {}]   ;;  %s711_s1 = inlined_call_operand.vmem [shape: f32[2,3,16,128], index: 1, kind: input, shape index: {}]   ;;  %s712_s2 = inlined_call_operand.vmem [shape: f32[2,3,1,128], index: 2, kind: output, shape index: {0}]   ;;  %s713_s3 = inlined_call_operand.vmem [shape: f32[2,3,1,128], index: 3, kind: output, shape index: {1}]   ;;  %s714_s4 = inlined_call_operand.vmem [shape: f32[2,3,1,128], index: 4, kind: output, shape index: {2}]  }
   0x1   :  { %s639_s17 = smov 0  }
   0x2 LB: > { %s27_s18 = sadd.s32 1, %s603_s16  ;;  %p553_p0 = scmp.ge.s32.totalorder %s607_s17, 1  ;;  %s607_s17 = sphi %s639_s17, %s15_s17   ;;  %s603_s16 = sphi %s637_s16, %s716_s16   ;;  %s599_s15 = sphi %s635_s15, %s715_s15  }
   0x3   : > { %p29_p1 = scmp.ge.s32.totalorder %s27_s18, 2  ;;  %p203_p2 = scmp.lt.s32.totalorder %s607_s17, 3 }
   0x5   : > { %s718_s18 = smov (%p29_p1, %s27_s18), 0  ;;  %p204_p3 = pnand %p553_p0, %p203_p2 }
   0x6   : > { %p250_p4 = scmp.lt.s32.totalorder (!%p204_p3), %s599_s15, 1 }
   0x7   : > { %207 = sbr.rel (%p204_p3) target bundleno = 49 (0x31), region = 28 }
   0xc   : > { %s720_s15 = smov (!%p250_p4, %s599_s15), 1  ;;  %v609_v0 = vmov 0.0  }
   0xd   : > { %s559_s19 = smul.u32 3, %s720_s15 }
   0xe   : > { %s558_s20 = smul.u32 48, %s720_s15 }
   0xf   : > { %s656_s23 = scalar_lea.vmem %s712_s2, %s559_s19  ;;  %s661_s26 = scalar_lea.vmem %s713_s3, %s559_s19 }
  0x10   : > { %285 = vst [vmem:[%s656_s23] sm:$0x1] %v609_v0  ;;  %286 = vst [vmem:[%s656_s23 + $0x1] sm:$0x1] %v609_v0  ;;  %s672_s29 = scalar_lea.vmem %s714_s4, %s559_s19  ;;  %s257_s6 = scalar_lea.vmem %s710_s0, %s558_s20 }
  0x11   : > { %287 = vst [vmem:[%s656_s23 + $0x2] sm:$0x1] %v609_v0  ;;  %288 = vst [vmem:[%s661_s26] sm:$0x1] %v609_v0  ;;  %v294_v1 = vld [vmem:[%s257_s6] sm:$0xff]  ;;  %v295_v2 = vld [vmem:[%s257_s6 + $0x8] sm:$0xff]  ;;  %s267_s9 = scalar_lea.vmem %s711_s1, %s558_s20 }
  0x12   : > { %289 = vst [vmem:[%s661_s26 + $0x1] sm:$0x1] %v609_v0  ;;  %290 = vst [vmem:[%s661_s26 + $0x2] sm:$0x1] %v609_v0  ;;  %v296_v3 = vld [vmem:[%s257_s6 + $0x10] sm:$0xff]  ;;  %v309_v4 = vadd.f32 %v295_v2, %v294_v1  ;;  %v297_v5 = vld [vmem:[%s257_s6 + $0x18] sm:$0xff] }
  0x13   : > { %291 = vst [vmem:[%s672_s29] sm:$0x1] %v609_v0  ;;  %292 = vst [vmem:[%s672_s29 + $0x1] sm:$0x1] %v609_v0  ;;  %v298_v6 = vld [vmem:[%s257_s6 + $0x20] sm:$0xff]  ;;  %v299_v7 = vld [vmem:[%s257_s6 + $0x28] sm:$0xff]  ;;  %v316_v8 = vadd.f32 %v297_v5, %v296_v3 }
  0x14   : > { %293 = vst [vmem:[%s672_s29 + $0x2] sm:$0x1] %v609_v0  ;;  %v323_v9 = vadd.f32 %v299_v7, %v298_v6  ;;  %v300_v10 = vld [vmem:[%s267_s9] sm:$0xff]  ;;  %v301_v11 = vld [vmem:[%s267_s9 + $0x8] sm:$0xff]  ;;  %v302_v12 = vld [vmem:[%s267_s9 + $0x10] sm:$0xff]  ;;  %v310_v13 = vrot.slane %v309_v4, 4 }
  0x15   : > { %v339_v14 = vmul.f32 %v300_v10, %v294_v1  ;;  %v340_v15 = vmul.f32 %v301_v11, %v295_v2  ;;  %v303_v16 = vld [vmem:[%s267_s9 + $0x18] sm:$0xff]  ;;  %v341_v17 = vmul.f32 %v302_v12, %v296_v3  ;;  %v304_v18 = vld [vmem:[%s267_s9 + $0x20] sm:$0xff]  ;;  %v305_v19 = vld [vmem:[%s267_s9 + $0x28] sm:$0xff]  ;;  %v317_v20 = vrot.slane %v316_v8, 4 }
  0x16   : > { %v324_v21 = vrot.slane %v323_v9, 4  ;;  %v342_v22 = vmul.f32 %v303_v16, %v297_v5  ;;  %v343_v23 = vmul.f32 %v304_v18, %v298_v6  ;;  %v311_v24 = vadd.f32 %v310_v13, %v309_v4 }
  0x17   : > { %v345_v25 = vadd.f32 %v340_v15, %v339_v14  ;;  %v344_v26 = vmul.f32 %v305_v19, %v299_v7  ;;  %v375_v27 = vadd.f32 %v301_v11, %v300_v10  ;;  %v318_v28 = vadd.f32 %v317_v20, %v316_v8  ;;  %v306_v52 = vld [vmem:[%s656_s23] sm:$0x1]  ;;  %v307_v58 = vld [vmem:[%s656_s23 + $0x1] sm:$0x1] }
  0x18   : > { %v325_v29 = vadd.f32 %v324_v21, %v323_v9  ;;  %v352_v30 = vadd.f32 %v342_v22, %v341_v17  ;;  %v382_v31 = vadd.f32 %v303_v16, %v302_v12  ;;  %v312_v32 = vrot.slane %v311_v24, 2  ;;  %v308_v59 = vld [vmem:[%s656_s23 + $0x2] sm:$0x1]  ;;  %v336_v9 = vld [vmem:[%s661_s26] sm:$0x1] }
  0x19   : > { %v346_v33 = vrot.slane %v345_v25, 4  ;;  %v359_v34 = vadd.f32 %v344_v26, %v343_v23  ;;  %v389_v35 = vadd.f32 %v305_v19, %v304_v18  ;;  %v319_v36 = vrot.slane %v318_v28, 2  ;;  %v337_v10 = vld [vmem:[%s661_s26 + $0x1] sm:$0x1]  ;;  %v338_v19 = vld [vmem:[%s661_s26 + $0x2] sm:$0x1] }
  0x1a   : > { %v326_v37 = vrot.slane %v325_v29, 2  ;;  %v353_v38 = vrot.slane %v352_v30, 4  ;;  %v376_v39 = vrot.slane %v375_v27, 4  ;;  %v313_v40 = vadd.f32 %v312_v32, %v311_v24  ;;  %v372_v15 = vld [vmem:[%s672_s29] sm:$0x1] }
  0x1b   : > { %v347_v41 = vadd.f32 %v346_v33, %v345_v25  ;;  %v360_v42 = vrot.slane %v359_v34, 4  ;;  %v383_v43 = vrot.slane %v382_v31, 4  ;;  %v320_v44 = vadd.f32 %v319_v36, %v318_v28  ;;  %v373_v21 = vld [vmem:[%s672_s29 + $0x1] sm:$0x1]  ;;  %v374_v33 = vld [vmem:[%s672_s29 + $0x2] sm:$0x1] }
  0x1c   : > { %v327_v45 = vadd.f32 %v326_v37, %v325_v29  ;;  %v354_v46 = vadd.f32 %v353_v38, %v352_v30  ;;  %v377_v47 = vadd.f32 %v376_v39, %v375_v27  ;;  %v314_v48 = vrot.slane %v313_v40, 1 }
  0x1d   : > { %v348_v49 = vrot.slane %v347_v41, 2  ;;  %v361_v50 = vadd.f32 %v360_v42, %v359_v34  ;;  %v384_v51 = vadd.f32 %v383_v43, %v382_v31  ;;  %v321_v53 = vrot.slane %v320_v44, 1 }
  0x1e   : > { %v328_v54 = vrot.slane %v327_v45, 1  ;;  %v355_v55 = vrot.slane %v354_v46, 2  ;;  %v378_v56 = vrot.slane %v377_v47, 2  ;;  %v315_v57 = vadd.f32 %v314_v48, %v313_v40 }
  0x1f   : > { %v349_v60 = vadd.f32 %v348_v49, %v347_v41  ;;  %v362_v61 = vrot.slane %v361_v50, 2  ;;  %v385_v62 = vrot.slane %v384_v51, 2  ;;  %v322_v63 = vadd.f32 %v321_v53, %v320_v44 }
  0x20   : > { %v329_v0 = vadd.f32 %v328_v54, %v327_v45  ;;  %v356_v1 = vadd.f32 %v355_v55, %v354_v46  ;;  %v379_v2 = vadd.f32 %v378_v56, %v377_v47  ;;  %v330_v3 = vadd.f32 %v315_v57, %v306_v52 }
  0x21   : > { %v350_v4 = vrot.slane %v349_v60, 1  ;;  %v363_v5 = vadd.f32 %v362_v61, %v361_v50  ;;  %v386_v6 = vadd.f32 %v385_v62, %v384_v51  ;;  %v331_v7 = vadd.f32 %v322_v63, %v307_v58 }
  0x22   : > { %v332_v8 = vadd.f32 %v329_v0, %v308_v59  ;;  %v357_v11 = vrot.slane %v356_v1, 1  ;;  %v380_v12 = vrot.slane %v379_v2, 1  ;;  %333 = vst [vmem:[%s656_s23] sm:$0x1] %v330_v3  ;;  %v390_v17 = vrot.slane %v389_v35, 4 }
  0x23   : > { %v351_v13 = vadd.f32 %v350_v4, %v349_v60  ;;  %v364_v14 = vrot.slane %v363_v5, 1  ;;  %v387_v16 = vrot.slane %v386_v6, 1  ;;  %334 = vst [vmem:[%s656_s23 + $0x1] sm:$0x1] %v331_v7 }
  0x24   : > { %335 = vst [vmem:[%s656_s23 + $0x2] sm:$0x1] %v332_v8  ;;  %v358_v18 = vadd.f32 %v357_v11, %v356_v1  ;;  %v381_v20 = vadd.f32 %v380_v12, %v379_v2  ;;  %v391_v25 = vadd.f32 %v390_v17, %v389_v35 }
  0x25   : > { %v366_v22 = vadd.f32 %v351_v13, %v336_v9  ;;  %v365_v23 = vadd.f32 %v364_v14, %v363_v5  ;;  %v388_v24 = vadd.f32 %v387_v16, %v386_v6 }
  0x26   : > { %v367_v26 = vadd.f32 %v358_v18, %v337_v10  ;;  %v396_v27 = vadd.f32 %v381_v20, %v372_v15  ;;  %v392_v30 = vrot.slane %v391_v25, 2 }
  0x27   : > { %369 = vst [vmem:[%s661_s26] sm:$0x1] %v366_v22  ;;  %v368_v28 = vadd.f32 %v365_v23, %v338_v19  ;;  %v397_v29 = vadd.f32 %v388_v24, %v373_v21 }
  0x28   : > { %370 = vst [vmem:[%s661_s26 + $0x1] sm:$0x1] %v367_v26  ;;  %399 = vst [vmem:[%s672_s29] sm:$0x1] %v396_v27  ;;  %v393_v31 = vadd.f32 %v392_v30, %v391_v25 }
  0x29   : > { %371 = vst [vmem:[%s661_s26 + $0x2] sm:$0x1] %v368_v28  ;;  %400 = vst [vmem:[%s672_s29 + $0x1] sm:$0x1] %v397_v29 }
  0x2a   : > { %v394_v32 = vrot.slane %v393_v31, 1 }
  0x2c   : > { %v395_v34 = vadd.f32 %v394_v32, %v393_v31 }
  0x2e   : > { %v398_v36 = vadd.f32 %v395_v34, %v374_v33 }
  0x30   : > { %401 = vst [vmem:[%s672_s29 + $0x2] sm:$0x1] %v398_v36 }
  0x31 PF: > { %s15_s17 = sadd.s32 1, %s607_s17   ;;  %s715_s15 = smov %s603_s16 }
  0x32   : > { %p12_p5 = scmp.ge.s32.totalorder %s15_s17, 4   ;;  %s716_s16 = smov %s718_s18 }
  0x34   :  { %14 = sbr.rel (!%p12_p5) target bundleno = 2 (0x2), region = 89 }

</bundles_post_ra>
